<compile_context>
chip_gen: v7x
topology: tpu7x:2x2x1
jax: 0.10.0
libtpu: 0.0.40
codegen_flags: <defaults>
</compile_context>

<pallas_src>
import functools
from dataclasses import dataclass
from typing import Tuple

import jax
import jax.numpy as jnp
from jax.experimental import pallas as pl
from jax.experimental.pallas import tpu as pltpu  # noqa: F401  (TPU backend)


# --------------------------------------------------------------------------
# Config (mirrors the GR00TConfig fields that matter for the forward pass)
# --------------------------------------------------------------------------
@dataclass
class GR00TConfig:
    action_dim: int = 6
    action_horizon: int = 16
    denoising_steps: int = 4
    image_size: Tuple[int, int] = (32, 32)   # small stand-in for (224, 224)
    patch_size: int = 8
    hidden_dim: int = 32       # logical context width
    fusion_hidden: int = 64    # logical fusion-MLP width
    head_hidden: int = 128     # velocity-head width (== lane width)


# ---- physical (lane-dense) dims ------------------------------------------
DP = 128          # padded hidden / fusion / head width
AP = 128          # padded flattened action (16*6 = 96 -> 128)
PK = 256          # padded patch feature dim (3*8*8 = 192 -> 256)
OBS_LANES = 256   # activation-slab lane width

# ---- weight-slab row offsets (multiples of 128 -> free static slices) ----
R_PE_F = 0        # front patch-embed   (PK rows)
R_PE_W = 256      # wrist patch-embed   (PK rows)
R_STATE = 512     # state embed         (DP rows)
R_F1_F = 640      # fusion L1, front slot
R_F1_W = 768      # fusion L1, wrist slot
R_F1_S = 896      # fusion L1, state slot
R_F2 = 1024       # fusion L2
R_V1_A = 1152     # velocity L1, action part
R_V1_C = 1280     # velocity L1, context part
R_V2 = 1408       # velocity L2
W_ROWS = 1536

# ---- const-slab row indices -----------------------------------------------
CB_PE_F, CB_PE_W, CB_STATE, CB_F1, CB_F2, CB_V1, CB_V2 = range(7)
C_NOISE = 7        # deterministic flow-matching noise (lanes 0..A-1)
C_TEMB0 = 8        # temb(k*dt) @ W_v1_temb, rows 8..8+steps-1
C_TEMB_HALF = 12   # temb(0.5)  @ W_v1_temb  (loss path)
C_ROWS = 16


# --------------------------------------------------------------------------
# In-kernel helpers
# --------------------------------------------------------------------------
def _mxu(x, w):
    """MXU matmul: bf16 inputs, f32 accumulate."""
    return jnp.dot(x.astype(w.dtype), w, preferred_element_type=jnp.float32)


def _encode_ctx(obs_ref, w_ref, c_ref):
    """Vision (mean-pooled patches, both cams) + state embed + fusion MLP."""
    f_emb = (_mxu(obs_ref[0:1, :], w_ref[R_PE_F:R_PE_F + PK, :])
             + c_ref[CB_PE_F:CB_PE_F + 1, :])
    w_emb = (_mxu(obs_ref[1:2, :], w_ref[R_PE_W:R_PE_W + PK, :])
             + c_ref[CB_PE_W:CB_PE_W + 1, :])
    s_emb = (_mxu(obs_ref[2:3, 0:DP], w_ref[R_STATE:R_STATE + DP, :])
             + c_ref[CB_STATE:CB_STATE + 1, :])
    # fused = [f_emb | w_emb | s_emb]; concat avoided via split matmuls.
    pre = (_mxu(f_emb, w_ref[R_F1_F:R_F1_F + DP, :])
           + _mxu(w_emb, w_ref[R_F1_W:R_F1_W + DP, :])
           + _mxu(s_emb, w_ref[R_F1_S:R_F1_S + DP, :])
           + c_ref[CB_F1:CB_F1 + 1, :])
    h = jnp.tanh(pre)
    return jnp.tanh(_mxu(h, w_ref[R_F2:R_F2 + DP, :]) + c_ref[CB_F2:CB_F2 + 1, :])


# --------------------------------------------------------------------------
# Fused kernels (gridless; whole problem lives in VMEM, << 1 MiB)
# --------------------------------------------------------------------------
def _action_kernel(obs_ref, w_ref, c_ref, act_ref, *, steps, dt):
    """Encoder + `steps` Euler steps of the flow-matching velocity MLP,
    statically unrolled.  ctx / timestep contributions hoisted out of loop."""
    ctx = _encode_ctx(obs_ref, w_ref, c_ref)
    w_v1_a = w_ref[R_V1_A:R_V1_A + DP, :]
    w_v2 = w_ref[R_V2:R_V2 + DP, :]
    b_v2 = c_ref[CB_V2:CB_V2 + 1, :]
    ctx_pre = (_mxu(ctx, w_ref[R_V1_C:R_V1_C + DP, :])
               + c_ref[CB_V1:CB_V1 + 1, :])
    a = c_ref[C_NOISE:C_NOISE + 1, :]                       # (1, AP) f32
    for k in range(steps):                                   # static unroll
        pre = _mxu(a, w_v1_a) + ctx_pre + c_ref[C_TEMB0 + k:C_TEMB0 + k + 1, :]
        h = jnp.tanh(pre)
        v = _mxu(h, w_v2) + b_v2
        a = a + dt * v                                       # f32 Euler update
    act_ref[...] = a


def _loss_kernel(obs_ref, w_ref, c_ref, loss_ref, *, t, inv_n):
    """Encoder + flow-matching training loss (x_t, velocity MLP, MSE)."""
    ctx = _encode_ctx(obs_ref, w_ref, c_ref)
    noise = c_ref[C_NOISE:C_NOISE + 1, :]
    tgt = obs_ref[3:4, 0:DP]
    x_t = (1.0 - t) * noise + t * tgt
    v_tgt = tgt - noise
    pre = (_mxu(x_t, w_ref[R_V1_A:R_V1_A + DP, :])
           + _mxu(ctx, w_ref[R_V1_C:R_V1_C + DP, :])
           + c_ref[C_TEMB_HALF:C_TEMB_HALF + 1, :]
           + c_ref[CB_V1:CB_V1 + 1, :])
    h = jnp.tanh(pre)
    v_pred = _mxu(h, w_ref[R_V2:R_V2 + DP, :]) + c_ref[CB_V2:CB_V2 + 1, :]
    d = v_pred - v_tgt              # padded lanes are exactly zero on both sides
    # TODO(synk): could route this scalar to SMEM instead of a (1,1) VMEM store.
    loss_ref[...] = jnp.sum(d * d, keepdims=True) * inv_n


def _run_action_kernel(obs, W, C, steps, dt):
    return pl.pallas_call(
        functools.partial(_action_kernel, steps=int(steps), dt=float(dt)),
        out_shape=jax.ShapeDtypeStruct((1, AP), jnp.float32),
    )(obs, W, C)


def _run_loss_kernel(obs, W, C, t, inv_n):
    out = pl.pallas_call(
        functools.partial(_loss_kernel, t=float(t), inv_n=float(inv_n)),
        out_shape=jax.ShapeDtypeStruct((1, 1), jnp.float32),
    )(obs, W, C)
    return out[0, 0]


# --------------------------------------------------------------------------
# Small numerics helpers (init-time only)
# --------------------------------------------------------------------------
def timestep_embedding(t, dim):
    half = dim // 2
    freqs = jnp.exp(-jnp.log(10000.0) * jnp.arange(half, dtype=jnp.float32) / half)
    ang = float(t) * freqs
    return jnp.concatenate([jnp.sin(ang), jnp.cos(ang)])    # (dim,)


# --------------------------------------------------------------------------
# GR00T policy (Pallas implementation)
# --------------------------------------------------------------------------
class GR00TPolicyPallas:
    def __init__(self, config: GR00TConfig, key):
        self.cfg = config
        p = config.patch_size
        patch_dim = 3 * p * p
        D = config.hidden_dim
        FH = config.fusion_hidden
        HH = config.head_hidden
        A = config.action_horizon * config.action_dim
        steps = config.denoising_steps
        assert patch_dim <= PK and D <= DP and FH <= DP and A <= AP
        assert HH == DP and steps <= 4
        self.A = A
        self.dt = 1.0 / steps

        ks = jax.random.split(key, 8)
        lin = lambda k, i, o: 0.02 * jax.random.normal(k, (i, o), jnp.float32)

        w_pe_front = lin(ks[0], patch_dim, D)
        w_pe_wrist = lin(ks[1], patch_dim, D)
        w_state = lin(ks[2], config.action_dim, D)
        w_f1 = lin(ks[3], 3 * D, FH)       # input = [f_emb | w_emb | s_emb]
        w_f2 = lin(ks[4], FH, D)
        w_v1 = lin(ks[5], A + 2 * D, HH)   # input = [action | ctx | temb]
        w_v2 = lin(ks[6], HH, A)
        noise_log = jax.random.normal(ks[7], (1, A), jnp.float32)

        # ---- single bf16 weight slab (one DMA per call) -------------------
        W = jnp.zeros((W_ROWS, DP), jnp.float32)
        W = W.at[R_PE_F:R_PE_F + patch_dim, :D].set(w_pe_front)
        W = W.at[R_PE_W:R_PE_W + patch_dim, :D].set(w_pe_wrist)
        W = W.at[R_STATE:R_STATE + config.action_dim, :D].set(w_state)
        W = W.at[R_F1_F:R_F1_F + D, :FH].set(w_f1[0:D])
        W = W.at[R_F1_W:R_F1_W + D, :FH].set(w_f1[D:2 * D])
        W = W.at[R_F1_S:R_F1_S + D, :FH].set(w_f1[2 * D:3 * D])
        W = W.at[R_F2:R_F2 + FH, :D].set(w_f2)
        W = W.at[R_V1_A:R_V1_A + A, :].set(w_v1[0:A])
        W = W.at[R_V1_C:R_V1_C + D, :].set(w_v1[A:A + D])
        W = W.at[R_V2:R_V2 + HH, :A].set(w_v2)
        self.W = W.astype(jnp.bfloat16)

        # ---- single f32 const slab: biases (zero), noise, precomputed temb
        w_v1_temb = w_v1[A + D:A + 2 * D]                      # (D, HH)
        temb_tab = jnp.stack([timestep_embedding(k * self.dt, D)
                              for k in range(steps)])           # (steps, D)
        temb_pre = temb_tab @ w_v1_temb                         # (steps, HH)
        temb_half_pre = timestep_embedding(0.5, D)[None, :] @ w_v1_temb
        C = jnp.zeros((C_ROWS, DP), jnp.float32)
        C = C.at[C_NOISE, :A].set(noise_log[0])
        C = C.at[C_TEMB0:C_TEMB0 + steps, :].set(temb_pre)
        C = C.at[C_TEMB_HALF, :].set(temb_half_pre[0])
        self.C = C

        self._select_action_jit = jax.jit(self._select_action_core)
        self._forward_jit = jax.jit(self._forward_core)

    # ------------------------------------------------------------------
    def _convert_batch(self, batch):
        """Mirror _convert_batch_to_groot: drop the batch dim (take sample 0)."""
        front = batch["observation"]["images"]["front"]
        wrist = batch["observation"]["images"]["wrist"]
        state = batch["observation"]["state"]
        if front.ndim == 4:
            front = front[0]
        if wrist.ndim == 4:
            wrist = wrist[0]
        if state.ndim == 2:
            state = state[0]
        return front, wrist, state

    # ------------------------------------------------------------------
    def _build_obs(self, front, wrist, state, target_flat=None):
        """One (8, 256) activation slab: [front_pool, wrist_pool, state, target]."""
        cfg = self.cfg
        p = cfg.patch_size
        H, Wd = cfg.image_size
        # mean(P) @ W == mean(P @ W): spatially mean-pool over the patch grid
        # (reshape + reduce only; no 6-D transpose), embed inside the kernel.
        imgs = jnp.stack([front, wrist]).astype(jnp.float32)       # (2,3,H,W)
        pooled = imgs.reshape(2, 3, H // p, p, Wd // p, p).mean(axis=(2, 4))
        pooled = pooled.reshape(2, 3 * p * p)                       # (2, 192)
        obs = jnp.zeros((8, OBS_LANES), jnp.float32)
        obs = obs.at[0:2, :3 * p * p].set(pooled)
        obs = obs.at[2, :cfg.action_dim].set(state.astype(jnp.float32))
        if target_flat is not None:
            obs = obs.at[3, :self.A].set(target_flat.astype(jnp.float32))
        return obs

    def _select_action_core(self, front, wrist, state, W, C):
        obs = self._build_obs(front, wrist, state)
        a_pad = _run_action_kernel(obs, W, C, self.cfg.denoising_steps, self.dt)
        # First horizon step; the single_arm[:5] / gripper[5:] split-then-
        # recombine of the reference is an identity, so just slice the leading
        # action_dim lanes of the (horizon, action_dim)-flattened result.
        return a_pad[:, :self.cfg.action_dim]                       # (1, adim)

    def _forward_core(self, front, wrist, state, target, W, C):
        obs = self._build_obs(front, wrist, state, target.reshape(-1))
        # TODO(synk): fixed t=0.5 + deterministic noise is a synthetic stand-in
        # for the real flow-matching training objective of the GR00T head.
        return _run_loss_kernel(obs, W, C, 0.5, 1.0 / self.A)

    # ------------------------------------------------------------------
    def select_action(self, batch):
        front, wrist, state = self._convert_batch(batch)
        return self._select_action_jit(front, wrist, state, self.W, self.C)

    def forward(self, batch):
        front, wrist, state = self._convert_batch(batch)
        target = batch["action"]
        if target.ndim == 3:
            target = target[0]                                      # (horizon, adim)
        loss = self._forward_jit(front, wrist, state,
                                 target.astype(jnp.float32), self.W, self.C)
        # loss stays a device array (no blocking float() in the hot path).
        return {"loss": loss, "metrics": {"loss": loss}}

    def reset(self):
        pass


# --------------------------------------------------------------------------
if __name__ == "__main__":
    cfg = GR00TConfig()
    key = jax.random.PRNGKey(0)
    k_params, k_f, k_w, k_s, k_a = jax.random.split(key, 5)

    policy = GR00TPolicyPallas(cfg, k_params)

    B = 2
    H, W = cfg.image_size
    batch = {
        "observation": {
            "images": {
                "front": jax.random.uniform(k_f, (B, 3, H, W), jnp.float32),
                "wrist": jax.random.uniform(k_w, (B, 3, H, W), jnp.float32),
            },
            "state": jax.random.normal(k_s, (B, cfg.action_dim), jnp.float32),
        },
        "action": jax.random.normal(
            k_a, (B, cfg.action_horizon, cfg.action_dim), jnp.float32
        ),
        "instruction": "pick up the cube",
    }

    action = policy.select_action(batch)
    out = policy.forward(batch)

    jax.block_until_ready(action)
    jax.block_until_ready(out["loss"])

    assert action.shape == (1, cfg.action_dim)
    assert out["loss"].shape == ()
    assert bool(jnp.isfinite(out["loss"]))
    print("KERNEL_OK")
</pallas_src>

<mosaic_0001>
module attributes {stable_mosaic.version = 11 : i64} {
  func.func @_action_kernel(%arg0: memref<8x256xf32, #tpu.memory_space<vmem>>, %arg1: memref<1536x128xbf16, #tpu.memory_space<vmem>>, %arg2: memref<16x128xf32, #tpu.memory_space<vmem>>, %arg3: memref<1x128xf32, #tpu.memory_space<vmem>>) attributes {dimension_semantics = [], scalar_prefetch = 0 : i64, scratch_operands = 0 : i64, tpu.core_type = #tpu.core_type<tc>} {
    %c0 = arith.constant 0 : index
    %c0_0 = arith.constant 0 : index
    %0 = vector.load %arg0[%c0, %c0_0] : memref<8x256xf32, #tpu.memory_space<vmem>>, vector<1x256xf32>
    %c0_1 = arith.constant 0 : index
    %c0_2 = arith.constant 0 : index
    %1 = vector.load %arg1[%c0_1, %c0_2] : memref<1536x128xbf16, #tpu.memory_space<vmem>>, vector<256x128xbf16>
    %2 = arith.truncf %0 : vector<1x256xf32> to vector<1x256xbf16>
    %cst = arith.constant dense<0.000000e+00> : vector<1x128xf32>
    %3 = tpu.matmul %2, %1, %cst {dimension_numbers = #tpu.dot_dimension_numbers<[1], [0], [0], [1], [0, 0, 1, 1], [], []>} : vector<1x256xbf16>, vector<256x128xbf16>, vector<1x128xf32> -> vector<1x128xf32>
    %c0_3 = arith.constant 0 : index
    %c0_4 = arith.constant 0 : index
    %4 = vector.load %arg2[%c0_3, %c0_4] : memref<16x128xf32, #tpu.memory_space<vmem>>, vector<1x128xf32>
    %5 = arith.addf %3, %4 : vector<1x128xf32>
    %c1 = arith.constant 1 : index
    %c0_5 = arith.constant 0 : index
    %6 = vector.load %arg0[%c1, %c0_5] : memref<8x256xf32, #tpu.memory_space<vmem>>, vector<1x256xf32>
    %c256 = arith.constant 256 : index
    %c0_6 = arith.constant 0 : index
    %7 = vector.load %arg1[%c256, %c0_6] : memref<1536x128xbf16, #tpu.memory_space<vmem>>, vector<256x128xbf16>
    %8 = arith.truncf %6 : vector<1x256xf32> to vector<1x256xbf16>
    %cst_7 = arith.constant dense<0.000000e+00> : vector<1x128xf32>
    %9 = tpu.matmul %8, %7, %cst_7 {dimension_numbers = #tpu.dot_dimension_numbers<[1], [0], [0], [1], [0, 0, 1, 1], [], []>} : vector<1x256xbf16>, vector<256x128xbf16>, vector<1x128xf32> -> vector<1x128xf32>
    %c1_8 = arith.constant 1 : index
    %c0_9 = arith.constant 0 : index
    %10 = vector.load %arg2[%c1_8, %c0_9] : memref<16x128xf32, #tpu.memory_space<vmem>>, vector<1x128xf32>
    %11 = arith.addf %9, %10 : vector<1x128xf32>
    %c2 = arith.constant 2 : index
    %c0_10 = arith.constant 0 : index
    %12 = vector.load %arg0[%c2, %c0_10] : memref<8x256xf32, #tpu.memory_space<vmem>>, vector<1x128xf32>
    %c512 = arith.constant 512 : index
    %c0_11 = arith.constant 0 : index
    %13 = vector.load %arg1[%c512, %c0_11] : memref<1536x128xbf16, #tpu.memory_space<vmem>>, vector<128x128xbf16>
    %14 = arith.truncf %12 : vector<1x128xf32> to vector<1x128xbf16>
    %cst_12 = arith.constant dense<0.000000e+00> : vector<1x128xf32>
    %15 = tpu.matmul %14, %13, %cst_12 {dimension_numbers = #tpu.dot_dimension_numbers<[1], [0], [0], [1], [0, 0, 1, 1], [], []>} : vector<1x128xbf16>, vector<128x128xbf16>, vector<1x128xf32> -> vector<1x128xf32>
    %c2_13 = arith.constant 2 : index
    %c0_14 = arith.constant 0 : index
    %16 = vector.load %arg2[%c2_13, %c0_14] : memref<16x128xf32, #tpu.memory_space<vmem>>, vector<1x128xf32>
    %17 = arith.addf %15, %16 : vector<1x128xf32>
    %c640 = arith.constant 640 : index
    %c0_15 = arith.constant 0 : index
    %18 = vector.load %arg1[%c640, %c0_15] : memref<1536x128xbf16, #tpu.memory_space<vmem>>, vector<128x128xbf16>
    %19 = arith.truncf %5 : vector<1x128xf32> to vector<1x128xbf16>
    %cst_16 = arith.constant dense<0.000000e+00> : vector<1x128xf32>
    %20 = tpu.matmul %19, %18, %cst_16 {dimension_numbers = #tpu.dot_dimension_numbers<[1], [0], [0], [1], [0, 0, 1, 1], [], []>} : vector<1x128xbf16>, vector<128x128xbf16>, vector<1x128xf32> -> vector<1x128xf32>
    %c768 = arith.constant 768 : index
    %c0_17 = arith.constant 0 : index
    %21 = vector.load %arg1[%c768, %c0_17] : memref<1536x128xbf16, #tpu.memory_space<vmem>>, vector<128x128xbf16>
    %22 = arith.truncf %11 : vector<1x128xf32> to vector<1x128xbf16>
    %cst_18 = arith.constant dense<0.000000e+00> : vector<1x128xf32>
    %23 = tpu.matmul %22, %21, %cst_18 {dimension_numbers = #tpu.dot_dimension_numbers<[1], [0], [0], [1], [0, 0, 1, 1], [], []>} : vector<1x128xbf16>, vector<128x128xbf16>, vector<1x128xf32> -> vector<1x128xf32>
    %24 = arith.addf %20, %23 : vector<1x128xf32>
    %c896 = arith.constant 896 : index
    %c0_19 = arith.constant 0 : index
    %25 = vector.load %arg1[%c896, %c0_19] : memref<1536x128xbf16, #tpu.memory_space<vmem>>, vector<128x128xbf16>
    %26 = arith.truncf %17 : vector<1x128xf32> to vector<1x128xbf16>
    %cst_20 = arith.constant dense<0.000000e+00> : vector<1x128xf32>
    %27 = tpu.matmul %26, %25, %cst_20 {dimension_numbers = #tpu.dot_dimension_numbers<[1], [0], [0], [1], [0, 0, 1, 1], [], []>} : vector<1x128xbf16>, vector<128x128xbf16>, vector<1x128xf32> -> vector<1x128xf32>
    %28 = arith.addf %24, %27 : vector<1x128xf32>
    %c3 = arith.constant 3 : index
    %c0_21 = arith.constant 0 : index
    %29 = vector.load %arg2[%c3, %c0_21] : memref<16x128xf32, #tpu.memory_space<vmem>>, vector<1x128xf32>
    %30 = arith.addf %28, %29 : vector<1x128xf32>
    %31 = math.tanh %30 : vector<1x128xf32>
    %c1024 = arith.constant 1024 : index
    %c0_22 = arith.constant 0 : index
    %32 = vector.load %arg1[%c1024, %c0_22] : memref<1536x128xbf16, #tpu.memory_space<vmem>>, vector<128x128xbf16>
    %33 = arith.truncf %31 : vector<1x128xf32> to vector<1x128xbf16>
    %cst_23 = arith.constant dense<0.000000e+00> : vector<1x128xf32>
    %34 = tpu.matmul %33, %32, %cst_23 {dimension_numbers = #tpu.dot_dimension_numbers<[1], [0], [0], [1], [0, 0, 1, 1], [], []>} : vector<1x128xbf16>, vector<128x128xbf16>, vector<1x128xf32> -> vector<1x128xf32>
    %c4 = arith.constant 4 : index
    %c0_24 = arith.constant 0 : index
    %35 = vector.load %arg2[%c4, %c0_24] : memref<16x128xf32, #tpu.memory_space<vmem>>, vector<1x128xf32>
    %36 = arith.addf %34, %35 : vector<1x128xf32>
    %37 = math.tanh %36 : vector<1x128xf32>
    %c1152 = arith.constant 1152 : index
    %c0_25 = arith.constant 0 : index
    %38 = vector.load %arg1[%c1152, %c0_25] : memref<1536x128xbf16, #tpu.memory_space<vmem>>, vector<128x128xbf16>
    %c1408 = arith.constant 1408 : index
    %c0_26 = arith.constant 0 : index
    %39 = vector.load %arg1[%c1408, %c0_26] : memref<1536x128xbf16, #tpu.memory_space<vmem>>, vector<128x128xbf16>
    %c6 = arith.constant 6 : index
    %c0_27 = arith.constant 0 : index
    %40 = vector.load %arg2[%c6, %c0_27] : memref<16x128xf32, #tpu.memory_space<vmem>>, vector<1x128xf32>
    %c1280 = arith.constant 1280 : index
    %c0_28 = arith.constant 0 : index
    %41 = vector.load %arg1[%c1280, %c0_28] : memref<1536x128xbf16, #tpu.memory_space<vmem>>, vector<128x128xbf16>
    %42 = arith.truncf %37 : vector<1x128xf32> to vector<1x128xbf16>
    %cst_29 = arith.constant dense<0.000000e+00> : vector<1x128xf32>
    %43 = tpu.matmul %42, %41, %cst_29 {dimension_numbers = #tpu.dot_dimension_numbers<[1], [0], [0], [1], [0, 0, 1, 1], [], []>} : vector<1x128xbf16>, vector<128x128xbf16>, vector<1x128xf32> -> vector<1x128xf32>
    %c5 = arith.constant 5 : index
    %c0_30 = arith.constant 0 : index
    %44 = vector.load %arg2[%c5, %c0_30] : memref<16x128xf32, #tpu.memory_space<vmem>>, vector<1x128xf32>
    %45 = arith.addf %43, %44 : vector<1x128xf32>
    %c7 = arith.constant 7 : index
    %c0_31 = arith.constant 0 : index
    %46 = vector.load %arg2[%c7, %c0_31] : memref<16x128xf32, #tpu.memory_space<vmem>>, vector<1x128xf32>
    %47 = arith.truncf %46 : vector<1x128xf32> to vector<1x128xbf16>
    %cst_32 = arith.constant dense<0.000000e+00> : vector<1x128xf32>
    %48 = tpu.matmul %47, %38, %cst_32 {dimension_numbers = #tpu.dot_dimension_numbers<[1], [0], [0], [1], [0, 0, 1, 1], [], []>} : vector<1x128xbf16>, vector<128x128xbf16>, vector<1x128xf32> -> vector<1x128xf32>
    %49 = arith.addf %48, %45 : vector<1x128xf32>
    %c8 = arith.constant 8 : index
    %c0_33 = arith.constant 0 : index
    %50 = vector.load %arg2[%c8, %c0_33] : memref<16x128xf32, #tpu.memory_space<vmem>>, vector<1x128xf32>
    %51 = arith.addf %49, %50 : vector<1x128xf32>
    %52 = math.tanh %51 : vector<1x128xf32>
    %53 = arith.truncf %52 : vector<1x128xf32> to vector<1x128xbf16>
    %cst_34 = arith.constant dense<0.000000e+00> : vector<1x128xf32>
    %54 = tpu.matmul %53, %39, %cst_34 {dimension_numbers = #tpu.dot_dimension_numbers<[1], [0], [0], [1], [0, 0, 1, 1], [], []>} : vector<1x128xbf16>, vector<128x128xbf16>, vector<1x128xf32> -> vector<1x128xf32>
    %55 = arith.addf %54, %40 : vector<1x128xf32>
    %cst_35 = arith.constant 2.500000e-01 : f32
    %56 = vector.broadcast %cst_35 : f32 to vector<1x128xf32>
    %57 = arith.mulf %56, %55 : vector<1x128xf32>
    %58 = arith.addf %46, %57 : vector<1x128xf32>
    %59 = arith.truncf %58 : vector<1x128xf32> to vector<1x128xbf16>
    %cst_36 = arith.constant dense<0.000000e+00> : vector<1x128xf32>
    %60 = tpu.matmul %59, %38, %cst_36 {dimension_numbers = #tpu.dot_dimension_numbers<[1], [0], [0], [1], [0, 0, 1, 1], [], []>} : vector<1x128xbf16>, vector<128x128xbf16>, vector<1x128xf32> -> vector<1x128xf32>
    %61 = arith.addf %60, %45 : vector<1x128xf32>
    %c9 = arith.constant 9 : index
    %c0_37 = arith.constant 0 : index
    %62 = vector.load %arg2[%c9, %c0_37] : memref<16x128xf32, #tpu.memory_space<vmem>>, vector<1x128xf32>
    %63 = arith.addf %61, %62 : vector<1x128xf32>
    %64 = math.tanh %63 : vector<1x128xf32>
    %65 = arith.truncf %64 : vector<1x128xf32> to vector<1x128xbf16>
    %cst_38 = arith.constant dense<0.000000e+00> : vector<1x128xf32>
    %66 = tpu.matmul %65, %39, %cst_38 {dimension_numbers = #tpu.dot_dimension_numbers<[1], [0], [0], [1], [0, 0, 1, 1], [], []>} : vector<1x128xbf16>, vector<128x128xbf16>, vector<1x128xf32> -> vector<1x128xf32>
    %67 = arith.addf %66, %40 : vector<1x128xf32>
    %cst_39 = arith.constant 2.500000e-01 : f32
    %68 = vector.broadcast %cst_39 : f32 to vector<1x128xf32>
    %69 = arith.mulf %68, %67 : vector<1x128xf32>
    %70 = arith.addf %58, %69 : vector<1x128xf32>
    %71 = arith.truncf %70 : vector<1x128xf32> to vector<1x128xbf16>
    %cst_40 = arith.constant dense<0.000000e+00> : vector<1x128xf32>
    %72 = tpu.matmul %71, %38, %cst_40 {dimension_numbers = #tpu.dot_dimension_numbers<[1], [0], [0], [1], [0, 0, 1, 1], [], []>} : vector<1x128xbf16>, vector<128x128xbf16>, vector<1x128xf32> -> vector<1x128xf32>
    %73 = arith.addf %72, %45 : vector<1x128xf32>
    %c10 = arith.constant 10 : index
    %c0_41 = arith.constant 0 : index
    %74 = vector.load %arg2[%c10, %c0_41] : memref<16x128xf32, #tpu.memory_space<vmem>>, vector<1x128xf32>
    %75 = arith.addf %73, %74 : vector<1x128xf32>
    %76 = math.tanh %75 : vector<1x128xf32>
    %77 = arith.truncf %76 : vector<1x128xf32> to vector<1x128xbf16>
    %cst_42 = arith.constant dense<0.000000e+00> : vector<1x128xf32>
    %78 = tpu.matmul %77, %39, %cst_42 {dimension_numbers = #tpu.dot_dimension_numbers<[1], [0], [0], [1], [0, 0, 1, 1], [], []>} : vector<1x128xbf16>, vector<128x128xbf16>, vector<1x128xf32> -> vector<1x128xf32>
    %79 = arith.addf %78, %40 : vector<1x128xf32>
    %cst_43 = arith.constant 2.500000e-01 : f32
    %80 = vector.broadcast %cst_43 : f32 to vector<1x128xf32>
    %81 = arith.mulf %80, %79 : vector<1x128xf32>
    %82 = arith.addf %70, %81 : vector<1x128xf32>
    %83 = arith.truncf %82 : vector<1x128xf32> to vector<1x128xbf16>
    %cst_44 = arith.constant dense<0.000000e+00> : vector<1x128xf32>
    %84 = tpu.matmul %83, %38, %cst_44 {dimension_numbers = #tpu.dot_dimension_numbers<[1], [0], [0], [1], [0, 0, 1, 1], [], []>} : vector<1x128xbf16>, vector<128x128xbf16>, vector<1x128xf32> -> vector<1x128xf32>
    %85 = arith.addf %84, %45 : vector<1x128xf32>
    %c11 = arith.constant 11 : index
    %c0_45 = arith.constant 0 : index
    %86 = vector.load %arg2[%c11, %c0_45] : memref<16x128xf32, #tpu.memory_space<vmem>>, vector<1x128xf32>
    %87 = arith.addf %85, %86 : vector<1x128xf32>
    %88 = math.tanh %87 : vector<1x128xf32>
    %89 = arith.truncf %88 : vector<1x128xf32> to vector<1x128xbf16>
    %cst_46 = arith.constant dense<0.000000e+00> : vector<1x128xf32>
    %90 = tpu.matmul %89, %39, %cst_46 {dimension_numbers = #tpu.dot_dimension_numbers<[1], [0], [0], [1], [0, 0, 1, 1], [], []>} : vector<1x128xbf16>, vector<128x128xbf16>, vector<1x128xf32> -> vector<1x128xf32>
    %91 = arith.addf %90, %40 : vector<1x128xf32>
    %cst_47 = arith.constant 2.500000e-01 : f32
    %92 = vector.broadcast %cst_47 : f32 to vector<1x128xf32>
    %93 = arith.mulf %92, %91 : vector<1x128xf32>
    %94 = arith.addf %82, %93 : vector<1x128xf32>
    %c0_48 = arith.constant 0 : index
    %c0_49 = arith.constant 0 : index
    %95 = vector.load %arg3[%c0_48, %c0_49] : memref<1x128xf32, #tpu.memory_space<vmem>>, vector<1x128xf32>
    tpu.vector_store %arg3[%c0_48, %c0_49], %94 {strides = array<i32>} : memref<1x128xf32, #tpu.memory_space<vmem>>, vector<1x128xf32>,
    return
  }
}

</mosaic_0001>

<bundles_post_ra>
// kernel: _select_action_core.1
= control target key start
LH: loop header
LB: loop body
LE: loop exit
PB: predicated region body
PF: predicated region fallthrough
CT: control target
= control target key end

     0   :  { %v50_v21 = vlaneseq  ;;  %v2197_v42 = vmov 0.0   ;;  %vm2198_vm0 = vmmov 0   ;;  %s2818_s0 = inlined_call_operand.vmem [shape: f32[8,256], index: 0, kind: input, shape index: {}]   ;;  %s2819_s1 = inlined_call_operand.vmem [shape: bf16[1536,128], index: 1, kind: input, shape index: {}]   ;;  %s2820_s2 = inlined_call_operand.vmem [shape: f32[16,128], index: 2, kind: input, shape index: {}]   ;;  %s2821_s3 = inlined_call_operand.hbm [shape: f32[1,128], index: 3, kind: output, shape index: {}]  }
   0x1   :  { %v2065_v0 = vld [vmem:[%s2819_s1 + $0x40] sm:$0xff]   ;;  %v2069_v4 = vld [vmem:[%s2819_s1 + $0x48] sm:$0xff]   ;;  %v2073_v8 = vld [vmem:[%s2819_s1 + $0x50] sm:$0xff]  }
   0x2   :  { %v2066_v1 = vld [vmem:[%s2819_s1 + $0xc0] sm:$0xff]   ;;  %1612 = vmatprep.subr.bf16.mxu0 %v2065_v0  ;;  %v2070_v5 = vld [vmem:[%s2819_s1 + $0xc8] sm:$0xff]   ;;  %v2074_v9 = vld [vmem:[%s2819_s1 + $0xd0] sm:$0xff]   ;;  %v51_v26 = vshrl.u32 %v50_v21, 7 }
   0x3   :  { %v2067_v2 = vld [vmem:[%s2819_s1] sm:$0xff]   ;;  %1634 = vmatprep.subr.bf16.mxu1 %v2066_v1  ;;  %v2071_v6 = vld [vmem:[%s2819_s1 + $0x8] sm:$0xff]   ;;  %v2075_v10 = vld [vmem:[%s2819_s1 + $0x10] sm:$0xff]  }
   0x4   :  { %v2068_v3 = vld [vmem:[%s2819_s1 + $0x80] sm:$0xff]   ;;  %1613 = vmatpush3.bf16.msra.mxu0 %v2067_v2  ;;  %v2072_v7 = vld [vmem:[%s2819_s1 + $0x88] sm:$0xff]   ;;  %v2076_v11 = vld [vmem:[%s2819_s1 + $0x90] sm:$0xff]   ;;  %v52_v31 = vsub.s32 0, %v51_v26  ;;  %v56_v33 = vsub.s32 1, %v51_v26 }
   0x5   :  { %1635 = vmatpush3.bf16.msra.mxu1 %v2068_v3  ;;  %1614 = vmatprep.subr.bf16.mxu0 %v2069_v4  ;;  %v2077_v12 = vld [vmem:[%s2819_s1 + $0x58] sm:$0xff]   ;;  %v2081_v16 = vld [vmem:[%s2819_s1 + $0x60] sm:$0xff]   ;;  %v2085_v20 = vld [vmem:[%s2819_s1 + $0x68] sm:$0xff]  }
   0x6   :  { %1636 = vmatprep.subr.bf16.mxu1 %v2070_v5  ;;  %v2078_v13 = vld [vmem:[%s2819_s1 + $0xd8] sm:$0xff]   ;;  %v2082_v17 = vld [vmem:[%s2819_s1 + $0xe0] sm:$0xff]   ;;  %v2086_v22 = vld [vmem:[%s2819_s1 + $0xe8] sm:$0xff]  }
   0x7   :  { %v2079_v14 = vld [vmem:[%s2819_s1 + $0x18] sm:$0xff]   ;;  %v2083_v18 = vld [vmem:[%s2819_s1 + $0x20] sm:$0xff]   ;;  %v2087_v23 = vld [vmem:[%s2819_s1 + $0x28] sm:$0xff]  }
   0x8   :  { %1615 = vmatpush3.bf16.msra.mxu0 %v2071_v6  ;;  %v2080_v15 = vld [vmem:[%s2819_s1 + $0x98] sm:$0xff]   ;;  %v2084_v19 = vld [vmem:[%s2819_s1 + $0xa0] sm:$0xff]   ;;  %v2088_v24 = vld [vmem:[%s2819_s1 + $0xa8] sm:$0xff]  }
   0x9   :  { %1637 = vmatpush3.bf16.msra.mxu1 %v2072_v7  ;;  %1616 = vmatprep.subr.bf16.mxu0 %v2073_v8  ;;  %v2089_v25 = vld [vmem:[%s2819_s1 + $0x70] sm:$0xff]   ;;  %v2093_v30 = vld [vmem:[%s2819_s1 + $0x78] sm:$0xff]   ;;  %v16_v36 = vld [vmem:[%s2818_s0] ss:$8 sm:$0x3] }
   0xa   :  { %1638 = vmatprep.subr.bf16.mxu1 %v2074_v9  ;;  %v2090_v27 = vld [vmem:[%s2819_s1 + $0xf0] sm:$0xff]   ;;  %v2094_v32 = vld [vmem:[%s2819_s1 + $0xf8] sm:$0xff]   ;;  %v1531_v37 = vld [vmem:[%s2818_s0 + $0x1] ss:$8 sm:$0x3]  ;;  %v53_v38 = vrot.slane %v16_v36, %v52_v31  ;;  %v57_v39 = vrot.slane %v16_v36, %v56_v33 }
   0xb   :  { %v2091_v28 = vld [vmem:[%s2819_s1 + $0x30] sm:$0xff]   ;;  %v2095_v34 = vld [vmem:[%s2819_s1 + $0x38] sm:$0xff]   ;;  %v237_v40 = vrot.slane %v1531_v37, %v52_v31  ;;  %v241_v41 = vrot.slane %v1531_v37, %v56_v33  ;;  %v2097_v47 = vld [vmem:[%s2819_s1 + $0x100] sm:$0xff]  }
   0xc   :  { %1617 = vmatpush3.bf16.msra.mxu0 %v2075_v10  ;;  %v2092_v29 = vld [vmem:[%s2819_s1 + $0xb0] sm:$0xff]   ;;  %v2096_v35 = vld [vmem:[%s2819_s1 + $0xb8] sm:$0xff]   ;;  %v60_v43 = vpack.c.bf16 %v53_v38, %v53_v38  ;;  %v61_v44 = vpack.c.bf16 %v57_v39, %v57_v39  ;;  %v2098_v48 = vld [vmem:[%s2819_s1 + $0x108] sm:$0xff]  }
   0xd   :  { %1639 = vmatpush3.bf16.msra.mxu1 %v2076_v11  ;;  %1618 = vmatprep.subr.bf16.mxu0 %v2077_v12  ;;  %v244_v45 = vpack.c.bf16 %v237_v40, %v237_v40  ;;  %v245_v46 = vpack.c.bf16 %v241_v41, %v241_v41  ;;  %v2105_v49 = vld [vmem:[%s2819_s1 + $0x180] sm:$0xff]   ;;  %v2099_v50 = vld [vmem:[%s2819_s1 + $0x110] sm:$0xff]   ;;  %v2107_v51 = vld [vmem:[%s2819_s1 + $0x188] sm:$0xff]  }
   0xe   :  { %1640 = vmatprep.subr.bf16.mxu1 %v2078_v13  ;;  %191 = vmatprep.mubr.bf16.mxu0 %v61_v44  ;;  %v2100_v52 = vld [vmem:[%s2819_s1 + $0x118] sm:$0xff]   ;;  %v2109_v53 = vld [vmem:[%s2819_s1 + $0x190] sm:$0xff]   ;;  %v2101_v54 = vld [vmem:[%s2819_s1 + $0x120] sm:$0xff]  }
   0xf   :  { %375 = vmatprep.mubr.bf16.mxu1 %v245_v46  ;;  %v2111_v55 = vld [vmem:[%s2819_s1 + $0x198] sm:$0xff]   ;;  %v2102_v56 = vld [vmem:[%s2819_s1 + $0x128] sm:$0xff]   ;;  %v2113_v57 = vld [vmem:[%s2819_s1 + $0x1a0] sm:$0xff]  }
  0x10   :  { %1619 = vmatpush3.bf16.msra.mxu0 %v2079_v14  ;;  %v2103_v58 = vld [vmem:[%s2819_s1 + $0x130] sm:$0xff]   ;;  %v2115_v59 = vld [vmem:[%s2819_s1 + $0x1a8] sm:$0xff]   ;;  %v2104_v60 = vld [vmem:[%s2819_s1 + $0x138] sm:$0xff]  }
  0x11   :  { %1641 = vmatpush3.bf16.msra.mxu1 %v2080_v15  ;;  %1620 = vmatprep.subr.bf16.mxu0 %v2081_v16  ;;  %v383_v61 = vld [vmem:[%s2818_s0 + $0x2] ss:$0 sm:$0xff]  ;;  %v2108_v0 = vld [vmem:[%s2819_s1 + $0x148] sm:$0xff]   ;;  %v2110_v1 = vld [vmem:[%s2819_s1 + $0x150] sm:$0xff]  }
  0x12   :  { %1642 = vmatprep.subr.bf16.mxu1 %v2082_v17  ;;  %v2106_v62 = vld [vmem:[%s2819_s1 + $0x140] sm:$0xff]   ;;  %v400_v63 = vpack.c.bf16 %v383_v61, %v383_v61  ;;  %v2112_v2 = vld [vmem:[%s2819_s1 + $0x158] sm:$0xff]  }
  0x14   :  { %1621 = vmatpush3.bf16.msra.mxu0 %v2083_v18 }
  0x15   :  { %1643 = vmatpush3.bf16.msra.mxu1 %v2084_v19  ;;  %1622 = vmatprep.subr.bf16.mxu0 %v2085_v20 }
  0x16   :  { %1644 = vmatprep.subr.bf16.mxu1 %v2086_v22 }
  0x18   :  { %1623 = vmatpush3.bf16.msra.mxu0 %v2087_v23 }
  0x19   :  { %1645 = vmatpush3.bf16.msra.mxu1 %v2088_v24  ;;  %1624 = vmatprep.subr.bf16.mxu0 %v2089_v25 }
  0x1a   :  { %1646 = vmatprep.subr.bf16.mxu1 %v2090_v27 }
  0x1c   :  { %1625 = vmatpush3.bf16.msra.mxu0 %v2091_v28 }
  0x1d   :  { %1647 = vmatpush3.bf16.msra.mxu1 %v2092_v29  ;;  %1626 = vmatprep.subr.bf16.mxu0 %v2093_v30 }
  0x1e   :  { %1648 = vmatprep.subr.bf16.mxu1 %v2094_v32 }
  0x20   :  { %1627 = vmatpush3.bf16.msra.mxu0 %v2095_v34 }
  0x21   :  { %1649 = vmatpush3.bf16.msra.mxu1 %v2096_v35  ;;  %1782 = vmatprep.subr.bf16.mxu0 %v2197_v42 }
  0x22   :  { %1802 = vmatprep.subr.bf16.mxu1 %v2197_v42 }
  0x23   :  { %192 = vmatmul.mubr.bf16.vlgmr.msra.gmra.mrb[0].mxu0 %v60_v43 }
  0x24   :  { %376 = vmatmul.mubr.bf16.vlgmr.msra.gmra.mrb[0].mxu1 %v244_v45  ;;  %1783 = vmatpush3.bf16.msra.mxu0 %v2097_v47 }
  0x25   :  { %1798 = vmatprep.mubr.msk.bf16.mxu0 %vm2198_vm0, %v2197_v42  ;;  %1784 = vmatprep.subr.bf16.mxu0 %v2197_v42 }
  0x26   :  { %1818 = vmatprep.mubr.msk.bf16.mxu1 %vm2198_vm0, %v2197_v42  ;;  %1803 = vmatpush3.bf16.msra.mxu1 %v2105_v49 }
  0x27   :  { %1804 = vmatprep.subr.bf16.mxu1 %v2197_v42 }
  0x28   :  { %1785 = vmatpush3.bf16.msra.mxu0 %v2098_v48 }
  0x29   :  { %1786 = vmatprep.subr.bf16.mxu0 %v2197_v42 }
  0x2a   :  { %1805 = vmatpush3.bf16.msra.mxu1 %v2107_v51 }
  0x2b   :  { %1806 = vmatprep.subr.bf16.mxu1 %v2197_v42 }
  0x2c   :  { %1787 = vmatpush3.bf16.msra.mxu0 %v2099_v50 }
  0x2d   :  { %1788 = vmatprep.subr.bf16.mxu0 %v2197_v42 }
  0x2e   :  { %1807 = vmatpush3.bf16.msra.mxu1 %v2109_v53 }
  0x2f   :  { %1808 = vmatprep.subr.bf16.mxu1 %v2197_v42 }
  0x30   :  { %1789 = vmatpush3.bf16.msra.mxu0 %v2100_v52 }
  0x31   :  { %1790 = vmatprep.subr.bf16.mxu0 %v2197_v42 }
  0x32   :  { %1809 = vmatpush3.bf16.msra.mxu1 %v2111_v55 }
  0x33   :  { %1810 = vmatprep.subr.bf16.mxu1 %v2197_v42 }
  0x34   :  { %1791 = vmatpush3.bf16.msra.mxu0 %v2101_v54 }
  0x35   :  { %1792 = vmatprep.subr.bf16.mxu0 %v2197_v42 }
  0x36   :  { %1811 = vmatpush3.bf16.msra.mxu1 %v2113_v57 }
  0x37   :  { %1812 = vmatprep.subr.bf16.mxu1 %v2197_v42 }
  0x38   :  { %1793 = vmatpush3.bf16.msra.mxu0 %v2102_v56 }
  0x39   :  { %1794 = vmatprep.subr.bf16.mxu0 %v2197_v42 }
  0x3a   :  { %1813 = vmatpush3.bf16.msra.mxu1 %v2115_v59 }
  0x3b   :  { %1814 = vmatprep.subr.bf16.mxu1 %v2197_v42 }
  0x3c   :  { %1795 = vmatpush3.bf16.msra.mxu0 %v2103_v58 }
  0x3d   :  { %1796 = vmatprep.subr.bf16.mxu0 %v2197_v42 }
  0x40   :  { %1797 = vmatpush3.bf16.msra.mxu0 %v2104_v60 }
  0x41   :  { %1822 = vmatprep.subr.bf16.mxu0 %v2197_v42 }
  0x43   :  { %1799 = vmatmul.mubr.bf16.vlgmr.msra.gmra.mrb[4].mxu0 %v400_v63 }
  0x44   :  { %1823 = vmatpush3.bf16.msra.mxu0 %v2106_v62  ;;  %1838 = vmatprep.mubr.msk.bf16.mxu0 %vm2198_vm0, %v2197_v42 }
  0x45   :  { %1824 = vmatprep.subr.bf16.mxu0 %v2197_v42 }
  0x48   :  { %1825 = vmatpush3.bf16.msra.mxu0 %v2108_v0 }
  0x49   :  { %1826 = vmatprep.subr.bf16.mxu0 %v2197_v42 }
  0x4c   :  { %1827 = vmatpush3.bf16.msra.mxu0 %v2110_v1 }
  0x4d   :  { %1828 = vmatprep.subr.bf16.mxu0 %v2197_v42 }
  0x4e   :  { %8 = vsyncpa [#allocation3], 0  ;;  %v2114_v3 = vld [vmem:[%s2819_s1 + $0x160] sm:$0xff]   ;;  %v2116_v4 = vld [vmem:[%s2819_s1 + $0x168] sm:$0xff]   ;;  %s2199_s12 = smov [#allocation2]  }
  0x4f   :  { %v2117_v5 = vld [vmem:[%s2819_s1 + $0x1b0] sm:$0xff]   ;;  %v2119_v7 = vld [vmem:[%s2819_s1 + $0x1b8] sm:$0xff]   ;;  %v62_v11 = vld [vmem:[%s2820_s2] sm:$0x1]  ;;  %s1507_s13 = sshll.u32 %s2199_s12, 4  ;;  %s1508_s13 = int_to_ptr.vmem [resolvable:$true] %s1507_s13 }
  0x50   :  { %1829 = vmatpush3.bf16.msra.mxu0 %v2112_v2  ;;  %v2118_v6 = vld [vmem:[%s2819_s1 + $0x170] sm:$0xff]   ;;  %1815 = vmatpush3.bf16.msra.mxu1 %v2117_v5  ;;  %v2120_v8 = vld [vmem:[%s2819_s1 + $0x178] sm:$0xff]   ;;  %v246_v13 = vld [vmem:[%s2820_s2 + $0x1] sm:$0x1]  ;;  %s2177_s14 = scalar_lea.vmem %s1508_s13, 32  ;;  %p2178_p1 = scmp.lt.s32.totalorder %s1508_s13, %s1508_s13 }
  0x51   :  { %1830 = vmatprep.subr.bf16.mxu0 %v2197_v42  ;;  %1816 = vmatprep.subr.bf16.mxu1 %v2197_v42  ;;  %v2121_v23 = vld [vmem:[%s2819_s1 + $0x1c0] sm:$0xff]   ;;  %v2122_v26 = vld [vmem:[%s2819_s1 + $0x1c8] sm:$0xff]   ;;  %v2123_v27 = vld [vmem:[%s2819_s1 + $0x1d0] sm:$0xff]  }
  0x52   :  { %v2124_v28 = vld [vmem:[%s2819_s1 + $0x1d8] sm:$0xff]   ;;  %v2125_v29 = vld [vmem:[%s2819_s1 + $0x1e0] sm:$0xff]   ;;  %v2126_v30 = vld [vmem:[%s2819_s1 + $0x1e8] sm:$0xff]  }
  0x53   :  { %v2127_v31 = vld [vmem:[%s2819_s1 + $0x1f0] sm:$0xff]   ;;  %v401_v32 = vld [vmem:[%s2820_s2 + $0x2] sm:$0x1]  ;;  %v2128_v36 = vld [vmem:[%s2819_s1 + $0x1f8] sm:$0xff]  }
  0x54   :  { %1831 = vmatpush3.bf16.msra.mxu0 %v2114_v3  ;;  %1817 = vmatpush3.bf16.msra.mxu1 %v2119_v7  ;;  %v2129_v40 = vld [vmem:[%s2819_s1 + $0x200] sm:$0xff]   ;;  %v2130_v41 = vld [vmem:[%s2819_s1 + $0x208] sm:$0xff]   ;;  %v2131_v43 = vld [vmem:[%s2819_s1 + $0x210] sm:$0xff]  }
  0x55   :  { %1832 = vmatprep.subr.bf16.mxu0 %v2197_v42  ;;  %1842 = vmatprep.subr.bf16.mxu1 %v2197_v42  ;;  %v2132_v44 = vld [vmem:[%s2819_s1 + $0x218] sm:$0xff]   ;;  %v2133_v45 = vld [vmem:[%s2819_s1 + $0x220] sm:$0xff]   ;;  %v2134_v46 = vld [vmem:[%s2819_s1 + $0x228] sm:$0xff]  }
  0x56   :  { %v2135_v47 = vld [vmem:[%s2819_s1 + $0x230] sm:$0xff]   ;;  %v2136_v48 = vld [vmem:[%s2819_s1 + $0x238] sm:$0xff]   ;;  %v2138_v49 = vld [vmem:[%s2819_s1 + $0x280] sm:$0xff]  }
  0x57   :  { %v2140_v50 = vld [vmem:[%s2819_s1 + $0x288] sm:$0xff]   ;;  %v2142_v51 = vld [vmem:[%s2819_s1 + $0x290] sm:$0xff]   ;;  %v2144_v52 = vld [vmem:[%s2819_s1 + $0x298] sm:$0xff]  }
  0x58   :  { %1833 = vmatpush3.bf16.msra.mxu0 %v2116_v4  ;;  %v806_v63 = vld [vmem:[%s2820_s2 + $0x3] sm:$0x1] }
  0x59   :  { %1834 = vmatprep.subr.bf16.mxu0 %v2197_v42 }
  0x5c   :  { %1835 = vmatpush3.bf16.msra.mxu0 %v2118_v6  ;;  %v2530_v6 = vld [vmem:[%s2819_s1 + $0x240] sm:$0xff]  }
  0x5d   :  { %1836 = vmatprep.subr.bf16.mxu0 %v2197_v42 }
  0x60   :  { %1837 = vmatpush3.bf16.msra.mxu0 %v2120_v8  ;;  %v2536_v8 = vld [vmem:[%s2819_s1 + $0x248] sm:$0xff]  }
  0x61   :  { %1862 = vmatprep.subr.bf16.mxu0 %v2197_v42 }
  0xf6   :  { %v1628_v9 = vpop.f32.mrb[0].mxu0 }
  0xf7   :  { %v1650_v10 = vpop.f32.mrb[0].mxu1  ;;  %v1629_v12 = vpop.f32.mrb[1].mxu0 }
  0xf8   :  { %v1651_v14 = vpop.f32.mrb[1].mxu1  ;;  %v1630_v15 = vadd.f32 %v1629_v12, %v1628_v9  ;;  %v1631_v17 = vpop.f32.mrb[2].mxu0  ;;  %v2545_v9 = vld [vmem:[%s2819_s1 + $0x250] sm:$0xff]   ;;  %v2146_v12 = vld [vmem:[%s2819_s1 + $0x2a0] sm:$0xff]  }
  0xf9   :  { %v1652_v16 = vadd.f32 %v1651_v14, %v1650_v10  ;;  %v1653_v18 = vpop.f32.mrb[2].mxu1  ;;  %v1632_v19 = vpop.f32.mrb[3].mxu0  ;;  %v2552_v10 = vld [vmem:[%s2819_s1 + $0x258] sm:$0xff]   ;;  %v2148_v14 = vld [vmem:[%s2819_s1 + $0x2a8] sm:$0xff]  }
  0xfa   :  { %v1654_v20 = vpop.f32.mrb[3].mxu1  ;;  %v194_v21 = vadd.f32 %v1630_v15, %v62_v11  ;;  %v2560_v11 = vld [vmem:[%s2819_s1 + $0x260] sm:$0xff]   ;;  %v2582_v15 = vld [vmem:[%s2819_s1 + $0x270] sm:$0xff]   ;;  %v2593_v17 = vld [vmem:[%s2819_s1 + $0x278] sm:$0xff]  }
  0xfb   :  { %v378_v22 = vadd.f32 %v1652_v16, %v246_v13  ;;  %v2571_v13 = vld [vmem:[%s2819_s1 + $0x268] sm:$0xff]   ;;  %v2150_v16 = vld [vmem:[%s2819_s1 + $0x2b0] sm:$0xff]   ;;  %v2152_v18 = vld [vmem:[%s2819_s1 + $0x2b8] sm:$0xff]  }
  0xfc   :  { %v506_v24 = vpack.c.bf16 %v194_v21, %v194_v21  ;;  %v2602_v19 = vld [vmem:[%s2820_s2 + $0x7] sm:$0x1]  ;;  %v826_v21 = vld [vmem:[%s2820_s2 + $0x4] sm:$0x1] }
  0xfd   :  { %v523_v25 = vpack.c.bf16 %v378_v22, %v378_v22  ;;  %v1056_v20 = vpack.c.bf16 %v2602_v19, %v2602_v19 }
  0xfe   :  { %1839 = vmatmul.mubr.bf16.vlgmr.msra.gmra.mrb[8].mxu0 %v506_v24 }
  0xff   :  { %1819 = vmatmul.mubr.bf16.vlgmr.msra.gmra.mrb[4].mxu1 %v523_v25  ;;  %1878 = vmatprep.mubr.msk.bf16.mxu0 %vm2198_vm0, %v2197_v42 }
 0x100   :  { %1843 = vmatpush3.bf16.msra.mxu1 %v2121_v23  ;;  %1858 = vmatprep.mubr.msk.bf16.mxu1 %vm2198_vm0, %v2197_v42 }
 0x101   :  { %1844 = vmatprep.subr.bf16.mxu1 %v2197_v42  ;;  %1863 = vmatpush3.bf16.msra.mxu0 %v2129_v40  ;;  %v2682_v40 = vld [vmem:[%s2819_s1 + $0x2f8] sm:$0xff]  }
 0x102   :  { %1864 = vmatprep.subr.bf16.mxu0 %v2197_v42 }
 0x104   :  { %1845 = vmatpush3.bf16.msra.mxu1 %v2122_v26 }
 0x105   :  { %1846 = vmatprep.subr.bf16.mxu1 %v2197_v42  ;;  %1865 = vmatpush3.bf16.msra.mxu0 %v2130_v41  ;;  %v966_v41 = vld [vmem:[%s2820_s2 + $0x5] sm:$0x1] }
 0x106   :  { %1866 = vmatprep.subr.bf16.mxu0 %v2197_v42 }
 0x108   :  { %1847 = vmatpush3.bf16.msra.mxu1 %v2123_v27 }
 0x109   :  { %1848 = vmatprep.subr.bf16.mxu1 %v2197_v42  ;;  %1867 = vmatpush3.bf16.msra.mxu0 %v2131_v43 }
 0x10a   :  { %1868 = vmatprep.subr.bf16.mxu0 %v2197_v42 }
 0x10c   :  { %1849 = vmatpush3.bf16.msra.mxu1 %v2124_v28  ;;  %v2632_v28 = vld [vmem:[%s2819_s1 + $0x2c0] sm:$0xff]  }
 0x10d   :  { %1850 = vmatprep.subr.bf16.mxu1 %v2197_v42  ;;  %1869 = vmatpush3.bf16.msra.mxu0 %v2132_v44 }
 0x10e   :  { %1870 = vmatprep.subr.bf16.mxu0 %v2197_v42 }
 0x110   :  { %1851 = vmatpush3.bf16.msra.mxu1 %v2125_v29 }
 0x111   :  { %1852 = vmatprep.subr.bf16.mxu1 %v2197_v42  ;;  %1871 = vmatpush3.bf16.msra.mxu0 %v2133_v45 }
 0x112   :  { %1872 = vmatprep.subr.bf16.mxu0 %v2197_v42 }
 0x114   :  { %1853 = vmatpush3.bf16.msra.mxu1 %v2126_v30  ;;  %v2638_v30 = vld [vmem:[%s2819_s1 + $0x2c8] sm:$0xff]  }
 0x115   :  { %1854 = vmatprep.subr.bf16.mxu1 %v2197_v42  ;;  %1873 = vmatpush3.bf16.msra.mxu0 %v2134_v46  ;;  %v1145_v46 = vld [vmem:[%s2820_s2 + $0x8] sm:$0x1] }
 0x116   :  { %v484_v33 = vpop.f32.mrb[4].mxu0  ;;  %1874 = vmatprep.subr.bf16.mxu0 %v2197_v42 }
 0x117   :  { %v485_v34 = vadd.f32 %v484_v33, %v401_v32  ;;  %v1800_v35 = vpop.f32.mrb[5].mxu0  ;;  %v2655_v33 = vld [vmem:[%s2819_s1 + $0x2d8] sm:$0xff]  }
 0x118   :  { %1855 = vmatpush3.bf16.msra.mxu1 %v2127_v31  ;;  %v487_v37 = vpop.f32.mrb[6].mxu0  ;;  %v2647_v31 = vld [vmem:[%s2819_s1 + $0x2d0] sm:$0xff]  }
 0x119   :  { %1856 = vmatprep.subr.bf16.mxu1 %v2197_v42  ;;  %v1801_v38 = vpop.f32.mrb[7].mxu0  ;;  %v716_v39 = vpack.c.bf16 %v485_v34, %v485_v34  ;;  %1875 = vmatpush3.bf16.msra.mxu0 %v2135_v47  ;;  %v2662_v37 = vld [vmem:[%s2819_s1 + $0x2e0] sm:$0xff]  }
 0x11a   :  { %1876 = vmatprep.subr.bf16.mxu0 %v2197_v42  ;;  %v2668_v38 = vld [vmem:[%s2819_s1 + $0x2e8] sm:$0xff]  }
 0x11c   :  { %1857 = vmatpush3.bf16.msra.mxu1 %v2128_v36 }
 0x11d   :  { %1882 = vmatprep.subr.bf16.mxu1 %v2197_v42  ;;  %1877 = vmatpush3.bf16.msra.mxu0 %v2136_v48 }
 0x11e   :  { %1902 = vmatprep.subr.bf16.mxu0 %v2197_v42 }
 0x11f   :  { %1859 = vmatmul.mubr.bf16.vlgmr.msra.gmra.mrb[8].mxu1 %v716_v39  ;;  %v2675_v39 = vld [vmem:[%s2819_s1 + $0x2f0] sm:$0xff]  }
 0x120   :  { %1898 = vmatprep.mubr.msk.bf16.mxu1 %vm2198_vm0, %v2197_v42  ;;  %1883 = vmatpush3.bf16.msra.mxu1 %v2138_v49 }
 0x121   :  { %1884 = vmatprep.subr.bf16.mxu1 %v2197_v42 }
 0x124   :  { %1885 = vmatpush3.bf16.msra.mxu1 %v2140_v50 }
 0x125   :  { %1886 = vmatprep.subr.bf16.mxu1 %v2197_v42 }
 0x128   :  { %1887 = vmatpush3.bf16.msra.mxu1 %v2142_v51 }
 0x129   :  { %1888 = vmatprep.subr.bf16.mxu1 %v2197_v42 }
 0x12c   :  { %1889 = vmatpush3.bf16.msra.mxu1 %v2144_v52 }
 0x12d   :  { %1890 = vmatprep.subr.bf16.mxu1 %v2197_v42 }
 0x130   :  { %1891 = vmatpush3.bf16.msra.mxu1 %v2146_v12 }
 0x131   :  { %1892 = vmatprep.subr.bf16.mxu1 %v2197_v42 }
 0x134   :  { %1893 = vmatpush3.bf16.msra.mxu1 %v2148_v14 }
 0x135   :  { %1894 = vmatprep.subr.bf16.mxu1 %v2197_v42 }
 0x138   :  { %1895 = vmatpush3.bf16.msra.mxu1 %v2150_v16 }
 0x139   :  { %1896 = vmatprep.subr.bf16.mxu1 %v2197_v42 }
 0x13c   :  { %1897 = vmatpush3.bf16.msra.mxu1 %v2152_v18 }
 0x13d   :  { %1922 = vmatprep.subr.bf16.mxu1 %v2197_v42 }
 0x1d1   :  { %v694_v54 = vpop.f32.mrb[8].mxu0 }
 0x1d2   :  { %v606_v53 = vpop.f32.mrb[4].mxu1  ;;  %v1840_v57 = vpop.f32.mrb[9].mxu0 }
 0x1d3   :  { %v695_v55 = vadd.f32 %v694_v54, %v606_v53  ;;  %v1820_v56 = vpop.f32.mrb[5].mxu1  ;;  %v697_v59 = vpop.f32.mrb[10].mxu0  ;;  %v2717_v53 = vld [vmem:[%s2820_s2 + $0x6] sm:$0x1] }
 0x1d4   :  { %v609_v58 = vpop.f32.mrb[6].mxu1  ;;  %v1841_v61 = vpop.f32.mrb[11].mxu0 }
 0x1d5   :  { %v1821_v60 = vpop.f32.mrb[7].mxu1 }
 0x1f2   :  { %v799_v62 = vpop.f32.mrb[8].mxu1 }
 0x1f3   :  { %v805_v0 = vadd.f32 %v799_v62, %v695_v55  ;;  %v1860_v1 = vpop.f32.mrb[9].mxu1 }
 0x1f4   :  { %v802_v2 = vpop.f32.mrb[10].mxu1 }
 0x1f5   :  { %v807_v3 = vadd.f32 %v806_v63, %v805_v0  ;;  %v1861_v4 = vpop.f32.mrb[11].mxu1  ;;  %v1280_v63 = vld [vmem:[%s2820_s2 + $0x9] sm:$0x1] }
 0x1f7   :  { %2161 = vtanh.f32 %v807_v3 }
 0x201   :  { %v2162_v5 = vpop.eup %2161 }
 0x202   :  { %v825_v7 = vpack.c.bf16 %v2162_v5, %v2162_v5 }
 0x204   :  { %1879 = vmatmul.mubr.bf16.vlgmr.msra.gmra.mrb[12].mxu0 %v825_v7 }
 0x205   :  { %1903 = vmatpush3.bf16.msra.mxu0 %v2530_v6  ;;  %1918 = vmatprep.mubr.msk.bf16.mxu0 %vm2198_vm0, %v2197_v42 }
 0x206   :  { %1904 = vmatprep.subr.bf16.mxu0 %v2197_v42 }
 0x209   :  { %1905 = vmatpush3.bf16.msra.mxu0 %v2536_v8 }
 0x20a   :  { %1906 = vmatprep.subr.bf16.mxu0 %v2197_v42 }
 0x20d   :  { %1907 = vmatpush3.bf16.msra.mxu0 %v2545_v9 }
 0x20e   :  { %1908 = vmatprep.subr.bf16.mxu0 %v2197_v42 }
 0x211   :  { %1909 = vmatpush3.bf16.msra.mxu0 %v2552_v10 }
 0x212   :  { %1910 = vmatprep.subr.bf16.mxu0 %v2197_v42 }
 0x215   :  { %1911 = vmatpush3.bf16.msra.mxu0 %v2560_v11 }
 0x216   :  { %1912 = vmatprep.subr.bf16.mxu0 %v2197_v42 }
 0x219   :  { %1913 = vmatpush3.bf16.msra.mxu0 %v2571_v13 }
 0x21a   :  { %1914 = vmatprep.subr.bf16.mxu0 %v2197_v42 }
 0x21d   :  { %1915 = vmatpush3.bf16.msra.mxu0 %v2582_v15 }
 0x21e   :  { %1916 = vmatprep.subr.bf16.mxu0 %v2197_v42 }
 0x221   :  { %1917 = vmatpush3.bf16.msra.mxu0 %v2593_v17 }
 0x222   :  { %1942 = vmatprep.subr.bf16.mxu0 %v2197_v42 }
 0x224   :  { %1919 = vmatmul.mubr.bf16.vlgmr.msra.gmra.mrb[16].mxu0 %v1056_v20 }
 0x225   :  { %1943 = vmatpush3.bf16.msra.mxu0 %v2530_v6  ;;  %1958 = vmatprep.mubr.msk.bf16.mxu0 %vm2198_vm0, %v2197_v42 }
 0x226   :  { %1944 = vmatprep.subr.bf16.mxu0 %v2197_v42 }
 0x229   :  { %1945 = vmatpush3.bf16.msra.mxu0 %v2536_v8 }
 0x22a   :  { %1946 = vmatprep.subr.bf16.mxu0 %v2197_v42 }
 0x22d   :  { %1947 = vmatpush3.bf16.msra.mxu0 %v2545_v9 }
 0x22e   :  { %1948 = vmatprep.subr.bf16.mxu0 %v2197_v42 }
 0x231   :  { %1949 = vmatpush3.bf16.msra.mxu0 %v2552_v10 }
 0x232   :  { %1950 = vmatprep.subr.bf16.mxu0 %v2197_v42 }
 0x235   :  { %1951 = vmatpush3.bf16.msra.mxu0 %v2560_v11 }
 0x236   :  { %1952 = vmatprep.subr.bf16.mxu0 %v2197_v42 }
 0x239   :  { %1953 = vmatpush3.bf16.msra.mxu0 %v2571_v13 }
 0x23a   :  { %1954 = vmatprep.subr.bf16.mxu0 %v2197_v42 }
 0x23d   :  { %1955 = vmatpush3.bf16.msra.mxu0 %v2582_v15 }
 0x23e   :  { %1956 = vmatprep.subr.bf16.mxu0 %v2197_v42 }
 0x241   :  { %1957 = vmatpush3.bf16.msra.mxu0 %v2593_v17 }
 0x242   :  { %1982 = vmatprep.subr.bf16.mxu0 %v2197_v42 }
 0x2d7   :  { %v909_v22 = vpop.f32.mrb[12].mxu0 }
 0x2d8   :  { %v910_v23 = vadd.f32 %v909_v22, %v826_v21  ;;  %v1880_v24 = vpop.f32.mrb[13].mxu0 }
 0x2d9   :  { %v912_v25 = vpop.f32.mrb[14].mxu0 }
 0x2da   :  { %2163 = vtanh.f32 %v910_v23  ;;  %v1881_v26 = vpop.f32.mrb[15].mxu0 }
 0x2e4   :  { %v2164_v27 = vpop.eup %2163 }
 0x2e5   :  { %v965_v29 = vpack.c.bf16 %v2164_v27, %v2164_v27 }
 0x2e7   :  { %1899 = vmatmul.mubr.bf16.vlgmr.msra.gmra.mrb[12].mxu1 %v965_v29 }
 0x2e8   :  { %1923 = vmatpush3.bf16.msra.mxu1 %v2632_v28  ;;  %1938 = vmatprep.mubr.msk.bf16.mxu1 %vm2198_vm0, %v2197_v42 }
 0x2e9   :  { %1924 = vmatprep.subr.bf16.mxu1 %v2197_v42 }
 0x2ec   :  { %1925 = vmatpush3.bf16.msra.mxu1 %v2638_v30 }
 0x2ed   :  { %1926 = vmatprep.subr.bf16.mxu1 %v2197_v42 }
 0x2f0   :  { %1927 = vmatpush3.bf16.msra.mxu1 %v2647_v31 }
 0x2f1   :  { %1928 = vmatprep.subr.bf16.mxu1 %v2197_v42 }
 0x2f4   :  { %1929 = vmatpush3.bf16.msra.mxu1 %v2655_v33 }
 0x2f5   :  { %1930 = vmatprep.subr.bf16.mxu1 %v2197_v42 }
 0x2f7   :  { %v1139_v32 = vpop.f32.mrb[16].mxu0 }
 0x2f8   :  { %v1920_v34 = vpop.f32.mrb[17].mxu0  ;;  %1931 = vmatpush3.bf16.msra.mxu1 %v2662_v37 }
 0x2f9   :  { %v1142_v35 = vpop.f32.mrb[18].mxu0  ;;  %1932 = vmatprep.subr.bf16.mxu1 %v2197_v42 }
 0x2fa   :  { %v1921_v36 = vpop.f32.mrb[19].mxu0 }
 0x2fc   :  { %1933 = vmatpush3.bf16.msra.mxu1 %v2668_v38 }
 0x2fd   :  { %1934 = vmatprep.subr.bf16.mxu1 %v2197_v42 }
 0x300   :  { %1935 = vmatpush3.bf16.msra.mxu1 %v2675_v39 }
 0x301   :  { %1936 = vmatprep.subr.bf16.mxu1 %v2197_v42 }
 0x304   :  { %1937 = vmatpush3.bf16.msra.mxu1 %v2682_v40 }
 0x305   :  { %1962 = vmatprep.subr.bf16.mxu1 %v2197_v42 }
 0x3ba   :  { %v1049_v43 = vpop.f32.mrb[12].mxu1 }
 0x3bb   :  { %v2690_v44 = vadd.f32 %v1049_v43, %v966_v41  ;;  %v1900_v45 = vpop.f32.mrb[13].mxu1 }
 0x3bc   :  { %v1052_v47 = vpop.f32.mrb[14].mxu1 }
 0x3bd   :  { %v1140_v48 = vadd.f32 %v1139_v32, %v2690_v44  ;;  %v1901_v49 = vpop.f32.mrb[15].mxu1 }
 0x3bf   :  { %v1146_v50 = vadd.f32 %v1145_v46, %v1140_v48 }
 0x3c1   :  { %2165 = vtanh.f32 %v1146_v50 }
 0x3cb   :  { %v2166_v51 = vpop.eup %2165 }
 0x3cc   :  { %v1148_v52 = vpack.c.bf16 %v2166_v51, %v2166_v51 }
 0x3ce   :  { %1939 = vmatmul.mubr.bf16.vlgmr.msra.gmra.mrb[16].mxu1 %v1148_v52 }
 0x3cf   :  { %1963 = vmatpush3.bf16.msra.mxu1 %v2632_v28  ;;  %1978 = vmatprep.mubr.msk.bf16.mxu1 %vm2198_vm0, %v2197_v42 }
 0x3d0   :  { %1964 = vmatprep.subr.bf16.mxu1 %v2197_v42 }
 0x3d3   :  { %1965 = vmatpush3.bf16.msra.mxu1 %v2638_v30 }
 0x3d4   :  { %1966 = vmatprep.subr.bf16.mxu1 %v2197_v42 }
 0x3d7   :  { %1967 = vmatpush3.bf16.msra.mxu1 %v2647_v31 }
 0x3d8   :  { %1968 = vmatprep.subr.bf16.mxu1 %v2197_v42 }
 0x3db   :  { %1969 = vmatpush3.bf16.msra.mxu1 %v2655_v33 }
 0x3dc   :  { %1970 = vmatprep.subr.bf16.mxu1 %v2197_v42 }
 0x3df   :  { %1971 = vmatpush3.bf16.msra.mxu1 %v2662_v37 }
 0x3e0   :  { %1972 = vmatprep.subr.bf16.mxu1 %v2197_v42 }
 0x3e3   :  { %1973 = vmatpush3.bf16.msra.mxu1 %v2668_v38 }
 0x3e4   :  { %1974 = vmatprep.subr.bf16.mxu1 %v2197_v42 }
 0x3e7   :  { %1975 = vmatpush3.bf16.msra.mxu1 %v2675_v39 }
 0x3e8   :  { %1976 = vmatprep.subr.bf16.mxu1 %v2197_v42 }
 0x3eb   :  { %1977 = vmatpush3.bf16.msra.mxu1 %v2682_v40 }
 0x3ec   :  { %2002 = vmatprep.subr.bf16.mxu1 %v2197_v42 }
 0x4a1   :  { %v1231_v54 = vpop.f32.mrb[16].mxu1 }
 0x4a2   :  { %v1232_v55 = vadd.f32 %v1231_v54, %v2717_v53  ;;  %v1940_v56 = vpop.f32.mrb[17].mxu1 }
 0x4a3   :  { %v1234_v57 = vpop.f32.mrb[18].mxu1 }
 0x4a4   :  { %v1237_v58 = vmul.f32 0.25, %v1232_v55  ;;  %v1941_v59 = vpop.f32.mrb[19].mxu1 }
 0x4a6   :  { %v1238_v60 = vadd.f32 %v1237_v58, %v2602_v19 }
 0x4a8   :  { %v1239_v61 = vpack.c.bf16 %v1238_v60, %v1238_v60 }
 0x4aa   :  { %1959 = vmatmul.mubr.bf16.vlgmr.msra.gmra.mrb[20].mxu0 %v1239_v61 }
 0x4ab   :  { %1983 = vmatpush3.bf16.msra.mxu0 %v2530_v6  ;;  %1998 = vmatprep.mubr.msk.bf16.mxu0 %vm2198_vm0, %v2197_v42 }
 0x4ac   :  { %1984 = vmatprep.subr.bf16.mxu0 %v2197_v42 }
 0x4af   :  { %1985 = vmatpush3.bf16.msra.mxu0 %v2536_v8 }
 0x4b0   :  { %1986 = vmatprep.subr.bf16.mxu0 %v2197_v42 }
 0x4b3   :  { %1987 = vmatpush3.bf16.msra.mxu0 %v2545_v9 }
 0x4b4   :  { %1988 = vmatprep.subr.bf16.mxu0 %v2197_v42 }
 0x4b7   :  { %1989 = vmatpush3.bf16.msra.mxu0 %v2552_v10 }
 0x4b8   :  { %1990 = vmatprep.subr.bf16.mxu0 %v2197_v42 }
 0x4bb   :  { %1991 = vmatpush3.bf16.msra.mxu0 %v2560_v11 }
 0x4bc   :  { %1992 = vmatprep.subr.bf16.mxu0 %v2197_v42 }
 0x4bf   :  { %1993 = vmatpush3.bf16.msra.mxu0 %v2571_v13 }
 0x4c0   :  { %1994 = vmatprep.subr.bf16.mxu0 %v2197_v42 }
 0x4c3   :  { %1995 = vmatpush3.bf16.msra.mxu0 %v2582_v15 }
 0x4c4   :  { %1996 = vmatprep.subr.bf16.mxu0 %v2197_v42 }
 0x4c7   :  { %1997 = vmatpush3.bf16.msra.mxu0 %v2593_v17 }
 0x4c8   :  { %2022 = vmatprep.subr.bf16.mxu0 %v2197_v42 }
 0x57d   :  { %v1274_v62 = vpop.f32.mrb[20].mxu0 }
 0x57e   :  { %v1275_v0 = vadd.f32 %v1274_v62, %v2690_v44  ;;  %v1960_v1 = vpop.f32.mrb[21].mxu0 }
 0x57f   :  { %v1277_v2 = vpop.f32.mrb[22].mxu0 }
 0x580   :  { %v1281_v3 = vadd.f32 %v1280_v63, %v1275_v0  ;;  %v1961_v4 = vpop.f32.mrb[23].mxu0 }
 0x582   :  { %2167 = vtanh.f32 %v1281_v3 }
 0x58c   :  { %v2168_v5 = vpop.eup %2167 }
 0x58d   :  { %v1283_v7 = vpack.c.bf16 %v2168_v5, %v2168_v5 }
 0x58f   :  { %1979 = vmatmul.mubr.bf16.vlgmr.msra.gmra.mrb[20].mxu1 %v1283_v7 }
 0x590   :  { %2003 = vmatpush3.bf16.msra.mxu1 %v2632_v28  ;;  %2018 = vmatprep.mubr.msk.bf16.mxu1 %vm2198_vm0, %v2197_v42 }
 0x591   :  { %2004 = vmatprep.subr.bf16.mxu1 %v2197_v42 }
 0x594   :  { %2005 = vmatpush3.bf16.msra.mxu1 %v2638_v30 }
 0x595   :  { %2006 = vmatprep.subr.bf16.mxu1 %v2197_v42 }
 0x598   :  { %2007 = vmatpush3.bf16.msra.mxu1 %v2647_v31 }
 0x599   :  { %2008 = vmatprep.subr.bf16.mxu1 %v2197_v42 }
 0x59c   :  { %2009 = vmatpush3.bf16.msra.mxu1 %v2655_v33 }
 0x59d   :  { %2010 = vmatprep.subr.bf16.mxu1 %v2197_v42 }
 0x5a0   :  { %2011 = vmatpush3.bf16.msra.mxu1 %v2662_v37 }
 0x5a1   :  { %2012 = vmatprep.subr.bf16.mxu1 %v2197_v42 }
 0x5a4   :  { %2013 = vmatpush3.bf16.msra.mxu1 %v2668_v38 }
 0x5a5   :  { %2014 = vmatprep.subr.bf16.mxu1 %v2197_v42 }
 0x5a8   :  { %2015 = vmatpush3.bf16.msra.mxu1 %v2675_v39 }
 0x5a9   :  { %2016 = vmatprep.subr.bf16.mxu1 %v2197_v42 }
 0x5ac   :  { %2017 = vmatpush3.bf16.msra.mxu1 %v2682_v40 }
 0x5ad   :  { %2042 = vmatprep.subr.bf16.mxu1 %v2197_v42 }
 0x662   :  { %v1318_v12 = vpop.f32.mrb[20].mxu1 }
 0x663   :  { %v1319_v14 = vadd.f32 %v1318_v12, %v2717_v53  ;;  %v1980_v16 = vpop.f32.mrb[21].mxu1 }
 0x664   :  { %v1321_v18 = vpop.f32.mrb[22].mxu1 }
 0x665   :  { %v1324_v19 = vmul.f32 0.25, %v1319_v14  ;;  %v1981_v20 = vpop.f32.mrb[23].mxu1 }
 0x667   :  { %v1325_v21 = vadd.f32 %v1324_v19, %v1238_v60 }
 0x669   :  { %v1326_v22 = vpack.c.bf16 %v1325_v21, %v1325_v21 }
 0x66b   :  { %1999 = vmatmul.mubr.bf16.vlgmr.msra.gmra.mrb[24].mxu0 %v1326_v22 }
 0x66c   :  { %2023 = vmatpush3.bf16.msra.mxu0 %v2530_v6  ;;  %2038 = vmatprep.mubr.msk.bf16.mxu0 %vm2198_vm0, %v2197_v42 }
 0x66d   :  { %2024 = vmatprep.subr.bf16.mxu0 %v2197_v42 }
 0x670   :  { %2025 = vmatpush3.bf16.msra.mxu0 %v2536_v8  ;;  %v1367_v8 = vld [vmem:[%s2820_s2 + $0xa] sm:$0x1] }
 0x671   :  { %2026 = vmatprep.subr.bf16.mxu0 %v2197_v42 }
 0x674   :  { %2027 = vmatpush3.bf16.msra.mxu0 %v2545_v9 }
 0x675   :  { %2028 = vmatprep.subr.bf16.mxu0 %v2197_v42 }
 0x678   :  { %2029 = vmatpush3.bf16.msra.mxu0 %v2552_v10 }
 0x679   :  { %2030 = vmatprep.subr.bf16.mxu0 %v2197_v42 }
 0x67c   :  { %2031 = vmatpush3.bf16.msra.mxu0 %v2560_v11 }
 0x67d   :  { %2032 = vmatprep.subr.bf16.mxu0 %v2197_v42 }
 0x680   :  { %2033 = vmatpush3.bf16.msra.mxu0 %v2571_v13 }
 0x681   :  { %2034 = vmatprep.subr.bf16.mxu0 %v2197_v42 }
 0x684   :  { %2035 = vmatpush3.bf16.msra.mxu0 %v2582_v15 }
 0x685   :  { %2036 = vmatprep.subr.bf16.mxu0 %v2197_v42 }
 0x688   :  { %2037 = vmatpush3.bf16.msra.mxu0 %v2593_v17 }
 0x73e   :  { %v1361_v6 = vpop.f32.mrb[24].mxu0 }
 0x73f   :  { %v1362_v9 = vadd.f32 %v1361_v6, %v2690_v44  ;;  %v2000_v10 = vpop.f32.mrb[25].mxu0 }
 0x740   :  { %v1364_v11 = vpop.f32.mrb[26].mxu0 }
 0x741   :  { %v1368_v23 = vadd.f32 %v1367_v8, %v1362_v9  ;;  %v2001_v24 = vpop.f32.mrb[27].mxu0 }
 0x743   :  { %2169 = vtanh.f32 %v1368_v23 }
 0x74d   :  { %v2170_v13 = vpop.eup %2169 }
 0x74e   :  { %v1370_v25 = vpack.c.bf16 %v2170_v13, %v2170_v13 }
 0x750   :  { %2019 = vmatmul.mubr.bf16.vlgmr.msra.gmra.mrb[24].mxu1 %v1370_v25 }
 0x751   :  { %2043 = vmatpush3.bf16.msra.mxu1 %v2632_v28  ;;  %2058 = vmatprep.mubr.msk.bf16.mxu1 %vm2198_vm0, %v2197_v42 }
 0x752   :  { %2044 = vmatprep.subr.bf16.mxu1 %v2197_v42 }
 0x755   :  { %2045 = vmatpush3.bf16.msra.mxu1 %v2638_v30 }
 0x756   :  { %2046 = vmatprep.subr.bf16.mxu1 %v2197_v42 }
 0x759   :  { %2047 = vmatpush3.bf16.msra.mxu1 %v2647_v31 }
 0x75a   :  { %2048 = vmatprep.subr.bf16.mxu1 %v2197_v42 }
 0x75d   :  { %2049 = vmatpush3.bf16.msra.mxu1 %v2655_v33  ;;  %v1454_v33 = vld [vmem:[%s2820_s2 + $0xb] sm:$0x1]  ;;  %s2173_s2 = scalar_lea.vmem %s1508_s13, 16 }
 0x75e   :  { %2050 = vmatprep.subr.bf16.mxu1 %v2197_v42  ;;  %p2174_p0 = scmp.ne.s32.totalorder %s1508_s13, %s2173_s2  ;;  %p2179_p2 = scmp.lt.s32.totalorder %s2177_s14, %s2173_s2 }
 0x760   :  { %p2180_p3 = por %p2179_p2, %p2178_p1 }
 0x761   :  { %2051 = vmatpush3.bf16.msra.mxu1 %v2662_v37 }
 0x762   :  { %2052 = vmatprep.subr.bf16.mxu1 %v2197_v42  ;;  %p2181_p4 = pnand %p2180_p3, %p2174_p0 }
 0x765   :  { %2053 = vmatpush3.bf16.msra.mxu1 %v2668_v38 }
 0x766   :  { %2054 = vmatprep.subr.bf16.mxu1 %v2197_v42 }
 0x769   :  { %2055 = vmatpush3.bf16.msra.mxu1 %v2675_v39 }
 0x76a   :  { %2056 = vmatprep.subr.bf16.mxu1 %v2197_v42 }
 0x76d   :  { %2057 = vmatpush3.bf16.msra.mxu1 %v2682_v40 }
 0x823   :  { %v1405_v15 = vpop.f32.mrb[24].mxu1 }
 0x824   :  { %v1406_v17 = vadd.f32 %v1405_v15, %v2717_v53  ;;  %v2020_v26 = vpop.f32.mrb[25].mxu1 }
 0x825   :  { %v1408_v27 = vpop.f32.mrb[26].mxu1 }
 0x826   :  { %v1411_v28 = vmul.f32 0.25, %v1406_v17  ;;  %v2021_v29 = vpop.f32.mrb[27].mxu1 }
 0x828   :  { %v1412_v30 = vadd.f32 %v1411_v28, %v1325_v21 }
 0x82a   :  { %v1413_v31 = vpack.c.bf16 %v1412_v30, %v1412_v30 }
 0x82c   :  { %2039 = vmatmul.mubr.bf16.vlgmr.msra.gmra.mrb[28].mxu0 %v1413_v31 }
 0x8ff   :  { %v1448_v32 = vpop.f32.mrb[28].mxu0 }
 0x900   :  { %v1449_v34 = vadd.f32 %v1448_v32, %v2690_v44  ;;  %v2040_v42 = vpop.f32.mrb[29].mxu0 }
 0x901   :  { %v1451_v35 = vpop.f32.mrb[30].mxu0 }
 0x902   :  { %v1455_v36 = vadd.f32 %v1454_v33, %v1449_v34  ;;  %v2041_v37 = vpop.f32.mrb[31].mxu0 }
 0x904   :  { %2171 = vtanh.f32 %v1455_v36 }
 0x90e   :  { %v2172_v38 = vpop.eup %2171 }
 0x90f   :  { %v1457_v39 = vpack.c.bf16 %v2172_v38, %v2172_v38 }
 0x911   :  { %2059 = vmatmul.mubr.bf16.vlgmr.msra.gmra.mrb[28].mxu1 %v1457_v39 }
 0x9e4   :  { %v1492_v40 = vpop.f32.mrb[28].mxu1 }
 0x9e5   :  { %v1493_v41 = vadd.f32 %v1492_v40, %v2717_v53  ;;  %v2060_v43 = vpop.f32.mrb[29].mxu1 }
 0x9e6   :  { %v1495_v45 = vpop.f32.mrb[30].mxu1 }
 0x9e7   :  { %v1498_v46 = vmul.f32 0.25, %v1493_v41  ;;  %v2061_v47 = vpop.f32.mrb[31].mxu1 }
 0x9e9   :  { %v1499_v48 = vadd.f32 %v1498_v46, %v1412_v30 }
 0x9eb   :  { %1500 = vst [vmem:[#allocation2] sm:$0x1] %v1499_v48 }
 0x9ec   :  { %2184 = shalt.err (!%p2181_p4)
}
 0x9ed   :  { %s2185_s17 = scalar_lea.hbm %s2821_s3, 16 }
 0x9ee   :  { %p2186_p5 = scmp.ne.s32.totalorder %s2821_s3, %s2185_s17  ;;  %p2189_p6 = scmp.lt.u32.totalorder %s2185_s17, %s2821_s3 }
 0x9f0   :  { %p2191_p7 = pnand %p2189_p6, %p2186_p5 }
 0x9f2   :  { %2194 = shalt.err (!%p2191_p7)
}
 0x9f3   :  { %1510 = dma.vmem_to_hbm [thread:$0]  %s1508_s13, 16, %s2821_s3, [#allocation3]  }
 0x9f4   :  { %2195 = dma.done.wait [#allocation3], 16  }
 0x9f5   :  { %2196 = vsyncadd [#allocation3], 4294967280 }
 0x9f6   :  { %1514 = vsyncpa [#allocation3], 1 }

</bundles_post_ra>
